<compile_context>
chip_gen: v7x
topology: tpu7x:2x2x1
jax: 0.10.0
libtpu: 0.0.40
codegen_flags: <defaults>
</compile_context>

<pallas_src>
import functools

import jax
import jax.numpy as jnp
from jax import lax
from jax.experimental import pallas as pl
from jax.experimental.pallas import tpu as pltpu


# ----------------------------------------------------------------------------
# Fused kernel: conv (one MXU matmul) + BN batch stats + affine + ReLU.
# Runs once (no grid); all operands are whole-array VMEM blocks.
# ----------------------------------------------------------------------------
def fused_conv_bn_relu_kernel(p_ref, w_ref, g_ref, b_ref, o_ref, *, eps, inv_count):
    # p_ref: (K, M)   im2col patches, lane dim M = N*H*W (dense, multiple of 128)
    # w_ref: (Cop, K) conv weight rows zero-padded to a multiple of 8 sublanes
    # g_ref: (Cop, 1) gamma (zero-padded rows)    b_ref: (Cop, 1) beta (zero-padded rows)
    # o_ref: (Cop, M) ReLU(BN(conv(x))) in channel-major, lane-dense layout
    y = jnp.dot(w_ref[...], p_ref[...], preferred_element_type=jnp.float32)  # (Cop, M)

    # training-mode (biased) per-channel batch statistics, two-pass variance
    mean = jnp.sum(y, axis=1, keepdims=True) * inv_count          # (Cop, 1)
    centered = y - mean
    var = jnp.sum(centered * centered, axis=1, keepdims=True) * inv_count

    scale = g_ref[...] * lax.rsqrt(var + eps)                      # EUP rsqrt, ~free
    o_ref[...] = jnp.maximum(centered * scale + b_ref[...], 0.0)


# ----------------------------------------------------------------------------
# Wrapper (accepts / returns NCHW to match the PyTorch module)
# ----------------------------------------------------------------------------
@functools.partial(jax.jit, static_argnames=("eps",))
def conv_bn_relu(x_nchw, w_oihw, gamma, beta, eps=1e-5):
    N, Cin, H, W = x_nchw.shape
    Cout, _, KH, KW = w_oihw.shape
    pad = 1                       # module default: kernel_size=3, stride=1, pad=1
    M = N * H * W                 # lane dim of the output (512 here, multiple of 128)
    K = KH * KW * Cin             # contraction depth (36)
    Cop = ((Cout + 7) // 8) * 8   # sublane-pad channels (no-op for Cout=8)

    x = x_nchw.astype(jnp.float32)

    # One-op im2col. Output spec "CNHW" gives (K, N, H, W) directly; the patch-channel
    # ordering is k = cin*KH*KW + kh*KW + kw, which matches w_oihw.reshape(Cout, K).
    patches = lax.conv_general_dilated_patches(
        x,
        filter_shape=(KH, KW),
        window_strides=(1, 1),
        padding=((pad, pad), (pad, pad)),
        dimension_numbers=("NCHW", "OIHW", "CNHW"),
    ).reshape(K, M)

    w2 = w_oihw.astype(jnp.float32).reshape(Cout, K)
    w2 = jnp.pad(w2, ((0, Cop - Cout), (0, 0)))
    g2 = jnp.pad(gamma.astype(jnp.float32), (0, Cop - Cout)).reshape(Cop, 1)
    b2 = jnp.pad(beta.astype(jnp.float32), (0, Cop - Cout)).reshape(Cop, 1)

    kernel = functools.partial(
        fused_conv_bn_relu_kernel, eps=float(eps), inv_count=1.0 / M)

    out_t = pl.pallas_call(
        kernel,
        out_shape=jax.ShapeDtypeStruct((Cop, M), jnp.float32),
        in_specs=[
            pl.BlockSpec(memory_space=pltpu.MemorySpace.VMEM),  # patches (K, M)
            pl.BlockSpec(memory_space=pltpu.MemorySpace.VMEM),  # weight  (Cop, K)
            pl.BlockSpec(memory_space=pltpu.MemorySpace.VMEM),  # gamma   (Cop, 1)
            pl.BlockSpec(memory_space=pltpu.MemorySpace.VMEM),  # beta    (Cop, 1)
        ],
        out_specs=pl.BlockSpec(memory_space=pltpu.MemorySpace.VMEM),
    )(patches, w2, g2, b2)

    # glue: strip channel padding, back to NCHW (16 KB of real data)
    out = out_t.reshape(Cop, N, H, W)[:Cout]
    return jnp.transpose(out, (1, 0, 2, 3))


# ----------------------------------------------------------------------------
# Pure-JAX reference (matches PyTorch ConvBnReLU.forward in training mode)
# ----------------------------------------------------------------------------
def reference(x_nchw, w_oihw, gamma, beta, eps=1e-5):
    y = lax.conv_general_dilated(
        x_nchw.astype(jnp.float32), w_oihw.astype(jnp.float32),
        window_strides=(1, 1), padding=((1, 1), (1, 1)),
        dimension_numbers=("NCHW", "OIHW", "NCHW"),
        precision=lax.Precision.HIGHEST)
    mean = jnp.mean(y, axis=(0, 2, 3), keepdims=True)
    var = jnp.var(y, axis=(0, 2, 3), keepdims=True)   # biased, like BN training
    yhat = (y - mean) / jnp.sqrt(var + eps)
    yhat = yhat * gamma.reshape(1, -1, 1, 1) + beta.reshape(1, -1, 1, 1)
    return jnp.maximum(yhat, 0.0)


if __name__ == "__main__":
    # module config: in_channels=4, out_channels=8, kernel_size=3, stride=1, pad=1
    N, Cin, Cout, H, W = 2, 4, 8, 16, 16

    key = jax.random.PRNGKey(0)
    kx, kw = jax.random.split(key)
    x = jax.random.normal(kx, (N, Cin, H, W), dtype=jnp.float32)
    # PyTorch conv weight shape: [Cout, Cin, KH, KW], bias=False
    weight = 0.1 * jax.random.normal(kw, (Cout, Cin, 3, 3), dtype=jnp.float32)
    # BatchNorm2d default-initialized affine params
    gamma = jnp.ones((Cout,), jnp.float32)
    beta = jnp.zeros((Cout,), jnp.float32)

    out = jax.block_until_ready(conv_bn_relu(x, weight, gamma, beta))
    ref = jax.block_until_ready(reference(x, weight, gamma, beta))

    assert out.shape == (N, Cout, H, W)
    assert jnp.allclose(out, ref, atol=1e-4, rtol=1e-4), (
        f"max abs err {jnp.max(jnp.abs(out - ref))}")

    print("KERNEL_OK")
</pallas_src>

<mosaic_0001>
module attributes {stable_mosaic.version = 11 : i64} {
  func.func @fused_conv_bn_relu_kernel(%arg0: memref<36x512xf32, #tpu.memory_space<vmem>>, %arg1: memref<8x36xf32, #tpu.memory_space<vmem>>, %arg2: memref<8x1xf32, #tpu.memory_space<vmem>>, %arg3: memref<8x1xf32, #tpu.memory_space<vmem>>, %arg4: memref<8x512xf32, #tpu.memory_space<vmem>>) attributes {dimension_semantics = [], scalar_prefetch = 0 : i64, scratch_operands = 0 : i64, tpu.core_type = #tpu.core_type<tc>} {
    %c0 = arith.constant 0 : index
    %c0_0 = arith.constant 0 : index
    %0 = vector.load %arg1[%c0, %c0_0] : memref<8x36xf32, #tpu.memory_space<vmem>>, vector<8x36xf32>
    %c0_1 = arith.constant 0 : index
    %c0_2 = arith.constant 0 : index
    %1 = vector.load %arg0[%c0_1, %c0_2] : memref<36x512xf32, #tpu.memory_space<vmem>>, vector<36x512xf32>
    %cst = arith.constant dense<0.000000e+00> : vector<8x512xf32>
    %2 = tpu.matmul %0, %1, %cst {dimension_numbers = #tpu.dot_dimension_numbers<[1], [0], [0], [1], [0, 0, 1, 1], [], []>} : vector<8x36xf32>, vector<36x512xf32>, vector<8x512xf32> -> vector<8x512xf32>
    %cst_3 = arith.constant dense<0.000000e+00> : vector<8xf32>
    %3 = vector.multi_reduction <add>, %2, %cst_3 [1] : vector<8x512xf32> to vector<8xf32>
    %4 = vector.shape_cast %3 : vector<8xf32> to vector<8x1xf32>
    %cst_4 = arith.constant 0.001953125 : f32
    %5 = vector.broadcast %cst_4 : f32 to vector<8x1xf32>
    %6 = arith.mulf %4, %5 : vector<8x1xf32>
    %7 = vector.broadcast %6 : vector<8x1xf32> to vector<8x512xf32>
    %8 = arith.subf %2, %7 : vector<8x512xf32>
    %9 = arith.mulf %8, %8 : vector<8x512xf32>
    %cst_5 = arith.constant dense<0.000000e+00> : vector<8xf32>
    %10 = vector.multi_reduction <add>, %9, %cst_5 [1] : vector<8x512xf32> to vector<8xf32>
    %11 = vector.shape_cast %10 : vector<8xf32> to vector<8x1xf32>
    %cst_6 = arith.constant 0.001953125 : f32
    %12 = vector.broadcast %cst_6 : f32 to vector<8x1xf32>
    %13 = arith.mulf %11, %12 : vector<8x1xf32>
    %c0_7 = arith.constant 0 : index
    %c0_8 = arith.constant 0 : index
    %14 = vector.load %arg2[%c0_7, %c0_8] : memref<8x1xf32, #tpu.memory_space<vmem>>, vector<8x1xf32>
    %cst_9 = arith.constant 9.99999974E-6 : f32
    %15 = vector.broadcast %cst_9 : f32 to vector<8x1xf32>
    %16 = arith.addf %13, %15 : vector<8x1xf32>
    %17 = math.rsqrt %16 : vector<8x1xf32>
    %18 = arith.mulf %14, %17 : vector<8x1xf32>
    %19 = vector.broadcast %18 : vector<8x1xf32> to vector<8x512xf32>
    %20 = arith.mulf %8, %19 : vector<8x512xf32>
    %c0_10 = arith.constant 0 : index
    %c0_11 = arith.constant 0 : index
    %21 = vector.load %arg3[%c0_10, %c0_11] : memref<8x1xf32, #tpu.memory_space<vmem>>, vector<8x1xf32>
    %22 = vector.broadcast %21 : vector<8x1xf32> to vector<8x512xf32>
    %23 = arith.addf %20, %22 : vector<8x512xf32>
    %cst_12 = arith.constant 0.000000e+00 : f32
    %24 = vector.broadcast %cst_12 : f32 to vector<8x512xf32>
    %25 = arith.maximumf %23, %24 : vector<8x512xf32>
    %c0_13 = arith.constant 0 : index
    %c0_14 = arith.constant 0 : index
    %26 = vector.load %arg4[%c0_13, %c0_14] : memref<8x512xf32, #tpu.memory_space<vmem>>, vector<8x512xf32>
    tpu.vector_store %arg4[%c0_13, %c0_14], %25 {strides = array<i32>} : memref<8x512xf32, #tpu.memory_space<vmem>>, vector<8x512xf32>,
    return
  }
}

</mosaic_0001>

<bundles_post_ra>
// kernel: conv_bn_relu.1
= control target key start
LH: loop header
LB: loop body
LE: loop exit
PB: predicated region body
PF: predicated region fallthrough
CT: control target
= control target key end

     0   :  { %v280_v3 = vmov 0.0   ;;  %vm42_vm0 = vcmask 1043456   ;;  %vm38_vm1 = vcmask 293888   ;;  %v281_v50 = vmov 0   ;;  %s388_s0 = inlined_call_operand.vmem [shape: f32[36,512], index: 0, kind: input, shape index: {}]   ;;  %s389_s1 = inlined_call_operand.vmem [shape: f32[8,36], index: 1, kind: input, shape index: {}]   ;;  %s390_s2 = inlined_call_operand.vmem [shape: f32[8,1], index: 2, kind: input, shape index: {}]   ;;  %s391_s3 = inlined_call_operand.vmem [shape: f32[8,1], index: 3, kind: input, shape index: {}]   ;;  %s392_s4 = inlined_call_operand.vmem [shape: f32[8,512], index: 4, kind: output, shape index: {}]  }
   0x1   :  { %v19_v0 = vld [vmem:[%s388_s0 + $0x8] sm:$0xff]  ;;  %v18_v2 = vld [vmem:[%s388_s0] sm:$0xff]  ;;  %119 = vmatprep.mubr.f32.mxu0 %v280_v3  ;;  %190 = vmatprep.mubr.f32.mxu1 %v280_v3  ;;  %v21_v6 = vld [vmem:[%s388_s0 + $0x18] sm:$0xff] }
   0x2   :  { %v23_v1 = vld [vmem:[%s388_s0 + $0x28] sm:$0xff]  ;;  %v22_v5 = vld [vmem:[%s388_s0 + $0x20] sm:$0xff]  ;;  %v25_v7 = vld [vmem:[%s388_s0 + $0x38] sm:$0xff]  ;;  %276 = vset.pattern.permute.xlu1 %v281_v50  ;;  %277 = vset.pattern.permute.xlu0 %v281_v50 }
   0x3   :  { %v258_v4 = vpack.c.bf16 %v23_v1, %v19_v0  ;;  %v260_v8 = vpack.c.bf16 %v22_v5, %v18_v2  ;;  %v266_v9 = vpack.c.bf16 %v25_v7, %v21_v6  ;;  %v20_v10 = vld [vmem:[%s388_s0 + $0x10] sm:$0xff]  ;;  %v27_v12 = vld [vmem:[%s388_s0 + $0x48] sm:$0xff]  ;;  %v26_v15 = vld [vmem:[%s388_s0 + $0x40] sm:$0xff] }
   0x4   :  { %v24_v11 = vld [vmem:[%s388_s0 + $0x30] sm:$0xff]  ;;  %v31_v14 = vld [vmem:[%s388_s0 + $0x68] sm:$0xff]  ;;  %v30_v16 = vld [vmem:[%s388_s0 + $0x60] sm:$0xff] }
   0x5   :  { %259 = vmatprep.subr.bf16.mxu0 %v258_v4  ;;  %v268_v13 = vpack.c.bf16 %v24_v11, %v20_v10  ;;  %267 = vmatprep.subr.bf16.mxu1 %v266_v9  ;;  %v262_v17 = vpack.c.bf16 %v31_v14, %v27_v12  ;;  %v264_v18 = vpack.c.bf16 %v30_v16, %v26_v15  ;;  %v29_v19 = vld [vmem:[%s388_s0 + $0x58] sm:$0xff]  ;;  %v28_v21 = vld [vmem:[%s388_s0 + $0x50] sm:$0xff]  ;;  %v35_v25 = vld [vmem:[%s388_s0 + $0x88] sm:$0xf] }
   0x6   :  { %261 = vmatpush1.bf16.msra.mxu0 %v260_v8  ;;  %v33_v20 = vld [vmem:[%s388_s0 + $0x78] sm:$0xff]  ;;  %v32_v23 = vld [vmem:[%s388_s0 + $0x70] sm:$0xff]  ;;  %v34_v27 = vld [vmem:[%s388_s0 + $0x80] sm:$0xf] }
   0x7   :  { %269 = vmatpush1.bf16.msra.mxu1 %v268_v13  ;;  %v270_v22 = vpack.c.bf16 %v33_v20, %v29_v19  ;;  %263 = vmatprep.subr.bf16.mxu0 %v262_v17  ;;  %v272_v24 = vpack.c.bf16 %v32_v23, %v28_v21  ;;  %v37_v26 = vld [vmem:[%s388_s0 + $0x98] sm:$0xf]  ;;  %v17_v28 = vld [vmem:[%s389_s1] sm:$0xff]  ;;  %v36_v29 = vld [vmem:[%s388_s0 + $0x90] sm:$0xf] }
   0x8   :  { %v217_v54 = vld [vmem:[%s390_s2] sm:$0xff] }
   0x9   :  { %271 = vmatprep.subr.bf16.mxu1 %v270_v22  ;;  %v230_v57 = vld [vmem:[%s391_s3] sm:$0xff] }
   0xa   :  { %265 = vmatpush1.bf16.msra.mxu0 %v264_v18 }
   0xb   :  { %273 = vmatpush1.bf16.msra.mxu1 %v272_v24  ;;  %252 = vmatprep.subr.msk.mxu0 %vm42_vm0, %v35_v25 }
   0xc   :  { %255 = vmatprep.subr.msk.mxu1 %vm42_vm0, %v37_v26 }
   0xe   :  { %253 = vmatpush1.msk.msra.mxu0 %vm42_vm0, %v34_v27 }
   0xf   :  { %254 = vmatmul.mubr.msk.f32.vlgmr.msra.gmra.mrb[0].mxu0 %vm38_vm1, %v17_v28  ;;  %256 = vmatpush1.msk.msra.mxu1 %vm42_vm0, %v36_v29 }
  0x10   :  { %257 = vmatmul.mubr.msk.f32.vlgmr.msra.gmra.mrb[0].mxu1 %vm38_vm1, %v17_v28 }
  0xe2   :  { %v121_v30 = vpop.f32.mrb[0].mxu0 }
  0xe3   :  { %v123_v31 = vpop.f32.mrb[1].mxu0  ;;  %v192_v32 = vpop.f32.mrb[0].mxu1 }
  0xe4   :  { %v197_v33 = vadd.f32 %v123_v31, %v121_v30  ;;  %v194_v34 = vpop.f32.mrb[1].mxu1 }
  0xe6   :  { %v198_v35 = vadd.f32 %v197_v33, %v192_v32 }
  0xe8   :  { %v199_v36 = vadd.f32 %v198_v35, %v194_v34 }
  0xea   :  { %200 = vadd.xlane.f32.xlu0 %v199_v36 }
 0x177   :  { %v201_v37 = vpop.xlane.xlu0 %200 }
 0x178   :  { %v202_v38 = vmul.f32 0.001953125, %v201_v37 }
 0x17a   :  { %v203_v39 = vsub.f32 %v121_v30, %v202_v38  ;;  %v204_v40 = vsub.f32 %v123_v31, %v202_v38  ;;  %v205_v41 = vsub.f32 %v192_v32, %v202_v38  ;;  %v206_v42 = vsub.f32 %v194_v34, %v202_v38 }
 0x17c   :  { %v207_v43 = vmul.f32 %v203_v39, %v203_v39  ;;  %v208_v44 = vmul.f32 %v204_v40, %v204_v40  ;;  %v209_v45 = vmul.f32 %v205_v41, %v205_v41  ;;  %v210_v47 = vmul.f32 %v206_v42, %v206_v42 }
 0x17e   :  { %v211_v46 = vadd.f32 %v208_v44, %v207_v43 }
 0x180   :  { %v212_v48 = vadd.f32 %v211_v46, %v209_v45 }
 0x182   :  { %v213_v49 = vadd.f32 %v212_v48, %v210_v47 }
 0x184   :  { %214 = vadd.xlane.f32.xlu0 %v213_v49 }
 0x211   :  { %v215_v51 = vpop.xlane.xlu0 %214 }
 0x212   :  { %v216_v52 = vmul.f32 0.001953125, %v215_v51 }
 0x214   :  { %v218_v53 = vadd.f32 1e-05, %v216_v52 }
 0x216   :  { %278 = vrsqrt.f32 %v218_v53 }
 0x220   :  { %v279_v55 = vpop.eup %278 }
 0x221   :  { %v220_v56 = vmul.f32 %v279_v55, %v217_v54 }
 0x223   :  { %223 = vperm.xlu1 %276, %v220_v56  }
 0x227   :  { %233 = vperm.xlu1 %276, %v230_v57  }
 0x2a2   :  { %v224_v58 = vpop.permute.xlu1 %223 }
 0x2a3   :  { %v226_v59 = vmul.f32 %v224_v58, %v203_v39  ;;  %v227_v60 = vmul.f32 %v224_v58, %v204_v40  ;;  %v228_v61 = vmul.f32 %v224_v58, %v205_v41  ;;  %v229_v62 = vmul.f32 %v224_v58, %v206_v42 }
 0x2a6   :  { %v234_v63 = vpop.permute.xlu1 %233 }
 0x2a7   :  { %v236_v0 = vadd.f32 %v234_v63, %v226_v59  ;;  %v237_v1 = vadd.f32 %v234_v63, %v227_v60  ;;  %v238_v2 = vadd.f32 %v234_v63, %v228_v61  ;;  %v239_v3 = vadd.f32 %v234_v63, %v229_v62 }
 0x2a9   :  { %v240_v4 = vmax.f32 %v236_v0, 0.0  ;;  %v241_v5 = vmax.f32 %v237_v1, 0.0  ;;  %v242_v6 = vmax.f32 %v238_v2, 0.0  ;;  %v243_v7 = vmax.f32 %v239_v3, 0.0 }
 0x2ab   :  { %244 = vst [vmem:[%s392_s4] sm:$0xff] %v240_v4  ;;  %245 = vst [vmem:[%s392_s4 + $0x8] sm:$0xff] %v241_v5 }
 0x2ac   :  { %246 = vst [vmem:[%s392_s4 + $0x10] sm:$0xff] %v242_v6  ;;  %247 = vst [vmem:[%s392_s4 + $0x18] sm:$0xff] %v243_v7 }

</bundles_post_ra>
